<compile_context>
chip_gen: v6e
topology: v6e:2x2x1
jax: 0.10.0
libtpu: 0.0.40
codegen_flags: <defaults>
</compile_context>

<pallas_src>
from dataclasses import dataclass

import numpy as np
import jax
import jax.numpy as jnp
from jax.experimental import pallas as pl
from jax.experimental.pallas import tpu as pltpu


@dataclass
class Config:
    n_embd: int = 64
    block_size: int = 8


RANK = 4  # Lora.rank in the reference module


# ---------------- Fused Pallas kernel ----------------

def _lora_kernel(x_ref, w1_ref, w2_ref, sc_ref, zp_ref, o_ref):
    # x:  (TM, C)   rows of the flattened (B*T, C) input
    # w1: (C, R)    linear1 weight (stored (in, out), so out = x @ w1)
    # w2: (R, C)    linear2 weight
    # sc: (3, C)    embed_scale1..3 stacked
    # zp: (3, C)    zero_point1..3 stacked
    # o:  (TM, C)
    x = x_ref[...]

    # Down-projection on the MXU: (TM, C) @ (C, R) -> (TM, R), f32 accumulate.
    h = jnp.dot(x, w1_ref[...], preferred_element_type=jnp.float32)

    # Up-projection has contraction K = rank = 4: far too narrow for the MXU
    # and it data-depends on the first dot, so expand it as RANK VPU
    # broadcast-FMAs instead of a second MXU round trip.
    w2 = w2_ref[...]                                   # (R, C), single load
    out = h[:, 0:1] * w2[0:1, :]
    for r in range(1, RANK):                           # static unroll (RANK=4)
        out = out + h[:, r:r + 1] * w2[r:r + 1, :]

    # ParamHeaveside forward: sum_i alpha_i * ((out - beta_i) > 0).
    # Two whole-(3,C) loads, slices stay in-register; init acc with branch 0.
    sc = sc_ref[...]
    zp = zp_ref[...]
    acc = jnp.where(out > zp[0:1, :], sc[0:1, :], 0.0)
    acc = acc + jnp.where(out > zp[1:2, :], sc[1:2, :], 0.0)
    acc = acc + jnp.where(out > zp[2:3, :], sc[2:3, :], 0.0)

    # NOTE: with C=64 (< 128 lanes) the store is a masked partial vst; only
    # worth restructuring to a lane-dense slab if vst becomes the saturated
    # slot at production shapes (prefer production C as a multiple of 128).
    o_ref[...] = acc.astype(o_ref.dtype)


def _pick_row_tile(M, C, itemsize):
    """Largest row tile that keeps the streamed x/out tiles inside a
    conservative VMEM budget (double-buffered: ~4 * row_tile * C * itemsize).
    Budget is sized for the smallest default scoped VMEM (v5e: 16 MiB), so the
    same tiling is safe on v5e/v6e/v7x without raising vmem_limit_bytes."""
    budget = 8 * 1024 * 1024
    cap = budget // max(1, 4 * C * itemsize)
    cap = min(cap, 2048)
    cap = max(8, (cap // 8) * 8)       # sublane-aligned
    if M <= cap:
        return M                        # single grid step: no per-step overhead
    return cap


def lora_forward(x, w1, w2, scales, zero_points):
    """x: (B, T, C). Returns (B, T, C)."""
    B, T, C = x.shape
    R = w1.shape[1]
    M = B * T
    x2 = x.reshape(M, C)

    itemsize = jnp.dtype(x.dtype).itemsize
    row_tile = _pick_row_tile(M, C, itemsize)
    grid = (pl.cdiv(M, row_tile),)

    # Constant operands revisit the same block every step; when the grid
    # actually iterates, single-buffer them so their VMEM can go to a bigger
    # row tile. With grid=(1,) (the small-M / demo path) the plain spec is
    # already minimal, so skip pipeline_mode there.
    if grid[0] > 1:
        def const_spec(shape):
            return pl.BlockSpec(shape, lambda i: (0, 0),
                                pipeline_mode=pl.Buffered(1))
    else:
        def const_spec(shape):
            return pl.BlockSpec(shape, lambda i: (0, 0))

    out = pl.pallas_call(
        _lora_kernel,
        out_shape=jax.ShapeDtypeStruct((M, C), x.dtype),
        grid=grid,
        in_specs=[
            pl.BlockSpec((row_tile, C), lambda i: (i, 0)),
            const_spec((C, R)),
            const_spec((R, C)),
            const_spec((3, C)),
            const_spec((3, C)),
        ],
        out_specs=pl.BlockSpec((row_tile, C), lambda i: (i, 0)),
        compiler_params=pltpu.CompilerParams(
            dimension_semantics=("parallel",)),   # megacore shard only if grid > 1
    )(x2, w1, w2, scales, zero_points)
    return out.reshape(B, T, C)


# ---------------- Pure-JAX reference for sanity check ----------------

def reference_forward(x, w1, w2, scales, zero_points):
    out = (x @ w1) @ w2
    y = jnp.zeros_like(out)
    for i in range(3):
        y = y + jnp.where(out > zero_points[i], scales[i], 0.0)
    return y


# ---------------- Main ----------------

if __name__ == "__main__":
    cfg = Config(n_embd=64, block_size=8)
    B, T, C = 2, cfg.block_size, cfg.n_embd

    key = jax.random.PRNGKey(0)
    k_x, k_w1, k_w2, k_sc2, k_sc3, k_zp2, k_zp3 = jax.random.split(key, 7)

    x = jax.random.normal(k_x, (B, T, C), dtype=jnp.float32)
    # nn.Linear weights stored as (in, out) so forward is x @ W (torch weight.T)
    w1 = 0.02 * jax.random.normal(k_w1, (C, RANK), dtype=jnp.float32)
    w2 = 0.02 * jax.random.normal(k_w2, (RANK, C), dtype=jnp.float32)
    # ParamHeaveside init: scale1=ones, zp1=zeros, others uniform[0,1).
    scales = jnp.stack([
        jnp.ones((C,), jnp.float32),
        jax.random.uniform(k_sc2, (C,), dtype=jnp.float32),
        jax.random.uniform(k_sc3, (C,), dtype=jnp.float32),
    ])
    zero_points = jnp.stack([
        jnp.zeros((C,), jnp.float32),
        jax.random.uniform(k_zp2, (C,), dtype=jnp.float32),
        jax.random.uniform(k_zp3, (C,), dtype=jnp.float32),
    ])

    # TODO(synk): act_heaveside's custom backward (arctan STE) is training-only;
    # only the forward semantics are implemented here.

    y = jax.block_until_ready(lora_forward(x, w1, w2, scales, zero_points))
    y_ref = reference_forward(x, w1, w2, scales, zero_points)
    np.testing.assert_allclose(np.asarray(y), np.asarray(y_ref),
                               rtol=1e-5, atol=1e-5)

    print("KERNEL_OK")
</pallas_src>

<mosaic_0001>
module attributes {stable_mosaic.version = 11 : i64} {
  func.func @_lora_kernel(%arg0: i32, %arg1: memref<16x64xf32, #tpu.memory_space<vmem>>, %arg2: memref<64x4xf32, #tpu.memory_space<vmem>>, %arg3: memref<4x64xf32, #tpu.memory_space<vmem>>, %arg4: memref<3x64xf32, #tpu.memory_space<vmem>>, %arg5: memref<3x64xf32, #tpu.memory_space<vmem>>, %arg6: memref<16x64xf32, #tpu.memory_space<vmem>>) attributes {dimension_semantics = [#tpu.dimension_semantics<parallel>], iteration_bounds = array<i64: 1>, scalar_prefetch = 0 : i64, scratch_operands = 0 : i64, tpu.core_type = #tpu.core_type<tc>, window_params = [{transform_indices = @transform_0, window_bounds = array<i64: 16, 64>}, {pipeline_mode = #tpu.pipeline_mode<synchronous>, transform_indices = @transform_1, window_bounds = array<i64: 64, 4>}, {pipeline_mode = #tpu.pipeline_mode<synchronous>, transform_indices = @transform_2, window_bounds = array<i64: 4, 64>}, {pipeline_mode = #tpu.pipeline_mode<synchronous>, transform_indices = @transform_3, window_bounds = array<i64: 3, 64>}, {pipeline_mode = #tpu.pipeline_mode<synchronous>, transform_indices = @transform_4, window_bounds = array<i64: 3, 64>}, {transform_indices = @transform_5, window_bounds = array<i64: 16, 64>}]} {
    %c0 = arith.constant 0 : index
    %c0_0 = arith.constant 0 : index
    %0 = vector.load %arg1[%c0, %c0_0] : memref<16x64xf32, #tpu.memory_space<vmem>>, vector<16x64xf32>
    %c0_1 = arith.constant 0 : index
    %c0_2 = arith.constant 0 : index
    %1 = vector.load %arg2[%c0_1, %c0_2] : memref<64x4xf32, #tpu.memory_space<vmem>>, vector<64x4xf32>
    %cst = arith.constant dense<0.000000e+00> : vector<16x4xf32>
    %2 = tpu.matmul %0, %1, %cst {dimension_numbers = #tpu.dot_dimension_numbers<[1], [0], [0], [1], [0, 0, 1, 1], [], []>} : vector<16x64xf32>, vector<64x4xf32>, vector<16x4xf32> -> vector<16x4xf32>
    %c0_3 = arith.constant 0 : index
    %c0_4 = arith.constant 0 : index
    %3 = vector.load %arg3[%c0_3, %c0_4] : memref<4x64xf32, #tpu.memory_space<vmem>>, vector<4x64xf32>
    %4 = vector.extract_strided_slice %2 {offsets = [0, 0], sizes = [16, 1], strides = [1, 1]} : vector<16x4xf32> to vector<16x1xf32>
    %5 = vector.extract_strided_slice %3 {offsets = [0, 0], sizes = [1, 64], strides = [1, 1]} : vector<4x64xf32> to vector<1x64xf32>
    %6 = vector.broadcast %4 : vector<16x1xf32> to vector<16x64xf32>
    %7 = vector.broadcast %5 : vector<1x64xf32> to vector<16x64xf32>
    %8 = arith.mulf %6, %7 : vector<16x64xf32>
    %9 = vector.extract_strided_slice %2 {offsets = [0, 1], sizes = [16, 1], strides = [1, 1]} : vector<16x4xf32> to vector<16x1xf32>
    %10 = vector.extract_strided_slice %3 {offsets = [1, 0], sizes = [1, 64], strides = [1, 1]} : vector<4x64xf32> to vector<1x64xf32>
    %11 = vector.broadcast %9 : vector<16x1xf32> to vector<16x64xf32>
    %12 = vector.broadcast %10 : vector<1x64xf32> to vector<16x64xf32>
    %13 = arith.mulf %11, %12 : vector<16x64xf32>
    %14 = arith.addf %8, %13 : vector<16x64xf32>
    %15 = vector.extract_strided_slice %2 {offsets = [0, 2], sizes = [16, 1], strides = [1, 1]} : vector<16x4xf32> to vector<16x1xf32>
    %16 = vector.extract_strided_slice %3 {offsets = [2, 0], sizes = [1, 64], strides = [1, 1]} : vector<4x64xf32> to vector<1x64xf32>
    %17 = vector.broadcast %15 : vector<16x1xf32> to vector<16x64xf32>
    %18 = vector.broadcast %16 : vector<1x64xf32> to vector<16x64xf32>
    %19 = arith.mulf %17, %18 : vector<16x64xf32>
    %20 = arith.addf %14, %19 : vector<16x64xf32>
    %21 = vector.extract_strided_slice %2 {offsets = [0, 3], sizes = [16, 1], strides = [1, 1]} : vector<16x4xf32> to vector<16x1xf32>
    %22 = vector.extract_strided_slice %3 {offsets = [3, 0], sizes = [1, 64], strides = [1, 1]} : vector<4x64xf32> to vector<1x64xf32>
    %23 = vector.broadcast %21 : vector<16x1xf32> to vector<16x64xf32>
    %24 = vector.broadcast %22 : vector<1x64xf32> to vector<16x64xf32>
    %25 = arith.mulf %23, %24 : vector<16x64xf32>
    %26 = arith.addf %20, %25 : vector<16x64xf32>
    %c0_5 = arith.constant 0 : index
    %c0_6 = arith.constant 0 : index
    %27 = vector.load %arg4[%c0_5, %c0_6] : memref<3x64xf32, #tpu.memory_space<vmem>>, vector<3x64xf32>
    %c0_7 = arith.constant 0 : index
    %c0_8 = arith.constant 0 : index
    %28 = vector.load %arg5[%c0_7, %c0_8] : memref<3x64xf32, #tpu.memory_space<vmem>>, vector<3x64xf32>
    %29 = vector.extract_strided_slice %28 {offsets = [0, 0], sizes = [1, 64], strides = [1, 1]} : vector<3x64xf32> to vector<1x64xf32>
    %30 = vector.broadcast %29 : vector<1x64xf32> to vector<16x64xf32>
    %31 = arith.cmpf ogt, %26, %30 : vector<16x64xf32>
    %32 = vector.extract_strided_slice %27 {offsets = [0, 0], sizes = [1, 64], strides = [1, 1]} : vector<3x64xf32> to vector<1x64xf32>
    %cst_9 = arith.constant 0.000000e+00 : f32
    %33 = vector.shape_cast %32 : vector<1x64xf32> to vector<1x64xf32>
    %34 = vector.broadcast %33 : vector<1x64xf32> to vector<16x64xf32>
    %35 = vector.broadcast %cst_9 : f32 to vector<16x64xf32>
    %36 = arith.select %31, %34, %35 : vector<16x64xi1>, vector<16x64xf32>
    %37 = vector.extract_strided_slice %28 {offsets = [1, 0], sizes = [1, 64], strides = [1, 1]} : vector<3x64xf32> to vector<1x64xf32>
    %38 = vector.broadcast %37 : vector<1x64xf32> to vector<16x64xf32>
    %39 = arith.cmpf ogt, %26, %38 : vector<16x64xf32>
    %40 = vector.extract_strided_slice %27 {offsets = [1, 0], sizes = [1, 64], strides = [1, 1]} : vector<3x64xf32> to vector<1x64xf32>
    %cst_10 = arith.constant 0.000000e+00 : f32
    %41 = vector.shape_cast %40 : vector<1x64xf32> to vector<1x64xf32>
    %42 = vector.broadcast %41 : vector<1x64xf32> to vector<16x64xf32>
    %43 = vector.broadcast %cst_10 : f32 to vector<16x64xf32>
    %44 = arith.select %39, %42, %43 : vector<16x64xi1>, vector<16x64xf32>
    %45 = arith.addf %36, %44 : vector<16x64xf32>
    %46 = vector.extract_strided_slice %28 {offsets = [2, 0], sizes = [1, 64], strides = [1, 1]} : vector<3x64xf32> to vector<1x64xf32>
    %47 = vector.broadcast %46 : vector<1x64xf32> to vector<16x64xf32>
    %48 = arith.cmpf ogt, %26, %47 : vector<16x64xf32>
    %49 = vector.extract_strided_slice %27 {offsets = [2, 0], sizes = [1, 64], strides = [1, 1]} : vector<3x64xf32> to vector<1x64xf32>
    %cst_11 = arith.constant 0.000000e+00 : f32
    %50 = vector.shape_cast %49 : vector<1x64xf32> to vector<1x64xf32>
    %51 = vector.broadcast %50 : vector<1x64xf32> to vector<16x64xf32>
    %52 = vector.broadcast %cst_11 : f32 to vector<16x64xf32>
    %53 = arith.select %48, %51, %52 : vector<16x64xi1>, vector<16x64xf32>
    %54 = arith.addf %45, %53 : vector<16x64xf32>
    %c0_12 = arith.constant 0 : index
    %c0_13 = arith.constant 0 : index
    %55 = vector.load %arg6[%c0_12, %c0_13] : memref<16x64xf32, #tpu.memory_space<vmem>>, vector<16x64xf32>
    tpu.vector_store %arg6[%c0_12, %c0_13], %54 {strides = array<i32>} : memref<16x64xf32, #tpu.memory_space<vmem>>, vector<16x64xf32>,
    return
  }
  func.func @transform_0(%arg0: i32) -> (i32, i32) {
    %c0_i32 = arith.constant 0 : i32
    %c0_i32_0 = arith.constant 0 : i32
    return %arg0, %c0_i32 : i32, i32
  }
  func.func @transform_1(%arg0: i32) -> (i32, i32) {
    %c0_i32 = arith.constant 0 : i32
    %c0_i32_0 = arith.constant 0 : i32
    %c0_i32_1 = arith.constant 0 : i32
    return %c0_i32, %c0_i32_0 : i32, i32
  }
  func.func @transform_2(%arg0: i32) -> (i32, i32) {
    %c0_i32 = arith.constant 0 : i32
    %c0_i32_0 = arith.constant 0 : i32
    %c0_i32_1 = arith.constant 0 : i32
    return %c0_i32, %c0_i32_0 : i32, i32
  }
  func.func @transform_3(%arg0: i32) -> (i32, i32) {
    %c0_i32 = arith.constant 0 : i32
    %c0_i32_0 = arith.constant 0 : i32
    %c0_i32_1 = arith.constant 0 : i32
    return %c0_i32, %c0_i32_0 : i32, i32
  }
  func.func @transform_4(%arg0: i32) -> (i32, i32) {
    %c0_i32 = arith.constant 0 : i32
    %c0_i32_0 = arith.constant 0 : i32
    %c0_i32_1 = arith.constant 0 : i32
    return %c0_i32, %c0_i32_0 : i32, i32
  }
  func.func @transform_5(%arg0: i32) -> (i32, i32) {
    %c0_i32 = arith.constant 0 : i32
    %c0_i32_0 = arith.constant 0 : i32
    return %arg0, %c0_i32 : i32, i32
  }
}

</mosaic_0001>

<bundles_post_ra>
// kernel: tpu_custom_call.1
= control target key start
LH: loop header
LB: loop body
LE: loop exit
PB: predicated region body
PF: predicated region fallthrough
CT: control target
= control target key end

     0   :  { %vm31_vm0 = vcmask 523264   ;;  %v305_v2 = vmov 1   ;;  %v306_v5 = vmov 0   ;;  %s388_s0 = inlined_call_operand.vmem [shape: f32[16,64], index: 0, kind: input, shape index: {}]   ;;  %s389_s1 = inlined_call_operand.vmem [shape: f32[64,4], index: 1, kind: input, shape index: {}]   ;;  %s390_s2 = inlined_call_operand.vmem [shape: f32[4,64], index: 2, kind: input, shape index: {}]   ;;  %s391_s3 = inlined_call_operand.vmem [shape: f32[3,64], index: 3, kind: input, shape index: {}]   ;;  %s392_s4 = inlined_call_operand.vmem [shape: f32[3,64], index: 4, kind: input, shape index: {}]   ;;  %s393_s5 = inlined_call_operand.hbm [shape: f32[16,64], index: 5, kind: output, shape index: {}]  }
   0x1   :  { %v30_v0 = vld [vmem:[%s389_s1 + $0x38] sm:$0xff]  ;;  %v29_v1 = vld [vmem:[%s389_s1 + $0x30] sm:$0xff]  ;;  %277 = vset.pattern.permute.xlu1 %v305_v2  ;;  %v28_v3 = vld [vmem:[%s389_s1 + $0x28] sm:$0xff]  ;;  %276 = vset.pattern.permute.xlu0 %v306_v5 }
   0x2   :  { %250 = vmatprep.subr.mxu0 %v30_v0  ;;  %v21_v4 = vld [vmem:[%s388_s0] sm:$0xff] }
   0x3   :  { %251 = vmatpush3.msra.mxu0 %v30_v0  ;;  %266 = vmatprep.mubr.msk.f32.mxu0 %vm31_vm0, %v21_v4 }
   0x4   :  { %252 = vmatprep.subr.mxu0 %v29_v1 }
   0x5   :  { %10 = vsyncpa [#allocation3], 0  ;;  %253 = vmatpush3.msra.mxu0 %v29_v1  ;;  %v27_v6 = vld [vmem:[%s389_s1 + $0x20] sm:$0xff]  ;;  %v26_v7 = vld [vmem:[%s389_s1 + $0x18] sm:$0xff]  ;;  %v307_v14 = vmov 2   ;;  %v308_v15 = vmov 3   ;;  %v124_v16 = vlaneseq }
   0x6   :  { %254 = vmatprep.subr.mxu0 %v28_v3  ;;  %v25_v8 = vld [vmem:[%s389_s1 + $0x10] sm:$0xff]  ;;  %v24_v9 = vld [vmem:[%s389_s1 + $0x8] sm:$0xff]  ;;  %v23_v10 = vld [vmem:[%s389_s1] sm:$0xff] }
   0x7   :  { %255 = vmatpush3.msra.mxu0 %v28_v3  ;;  %v22_v11 = vld [vmem:[%s388_s0 + $0x8] sm:$0xff]  ;;  %v125_v17 = vshrl.u32 %v124_v16, 7  ;;  %v113_v22 = vld [vmem:[%s390_s2] sm:$0xf] }
   0x8   :  { %256 = vmatprep.subr.mxu0 %v27_v6  ;;  %v179_v38 = vld [vmem:[%s392_s4] sm:$0x7] }
   0x9   :  { %257 = vmatpush3.msra.mxu0 %v27_v6  ;;  %v140_v20 = vsub.s32 1, %v125_v17  ;;  %v126_v21 = vsub.s32 0, %v125_v17  ;;  %v156_v23 = vsub.s32 2, %v125_v17  ;;  %v172_v29 = vsub.s32 3, %v125_v17  ;;  %v178_v42 = vld [vmem:[%s391_s3] sm:$0x7] }
   0xa   :  { %258 = vmatprep.subr.mxu0 %v26_v7  ;;  %s309_s3 = smov [#allocation2]  }
   0xb   :  { %259 = vmatpush3.msra.mxu0 %v26_v7  ;;  %v141_v25 = vrot.slane %v113_v22, %v140_v20  ;;  %v127_v26 = vrot.slane %v113_v22, %v126_v21  ;;  %v157_v28 = vrot.slane %v113_v22, %v156_v23  ;;  %v173_v37 = vrot.slane %v113_v22, %v172_v29  ;;  %s227_s4 = sshll.u32 %s309_s3, 4  ;;  %s228_s4 = int_to_ptr.vmem [resolvable:$true] %s227_s4 }
   0xc   :  { %260 = vmatprep.subr.mxu0 %v25_v8  ;;  %v183_v43 = vrot.slane %v179_v38, %v126_v21  ;;  %v195_v44 = vrot.slane %v179_v38, %v140_v20  ;;  %v209_v47 = vrot.slane %v179_v38, %v156_v23  ;;  %v189_v51 = vrot.slane %v178_v42, %v126_v21  ;;  %s283_s16 = scalar_lea.vmem %s228_s4, 256  ;;  %p288_p1 = scmp.lt.s32.totalorder %s228_s4, %s228_s4 }
   0xd   :  { %261 = vmatpush3.msra.mxu0 %v25_v8  ;;  %v201_v52 = vrot.slane %v178_v42, %v140_v20  ;;  %v215_v55 = vrot.slane %v178_v42, %v156_v23  ;;  %p284_p0 = scmp.ne.s32.totalorder %s228_s4, %s283_s16  ;;  %p289_p2 = scmp.lt.s32.totalorder %s283_s16, %s283_s16 }
   0xe   :  { %262 = vmatprep.subr.mxu0 %v24_v9 }
   0xf   :  { %263 = vmatpush3.msra.mxu0 %v24_v9  ;;  %p290_p3 = por %p289_p2, %p288_p1 }
  0x10   :  { %264 = vmatprep.subr.mxu0 %v23_v10 }
  0x11   :  { %265 = vmatpush3.msra.mxu0 %v23_v10  ;;  %p291_p4 = pnand %p290_p3, %p284_p0 }
  0x12   :  { %267 = vmatmul.mubr.msk.f32.vlgmr.msra.gmra.mxu0 %vm31_vm0, %v22_v11 }
  0xd2   :  { %v268_v12 = vpop.f32.mrf.mxu0 }
  0xd3   :  { %135 = vperm.xlu1 %277, %v268_v12   ;;  %121 = vperm.xlu0 %276, %v268_v12  }
  0xd4   :  { %v104_v13 = vpop.f32.mrf.mxu0 }
  0xd7   :  { %278 = vset.pattern.permute.xlu1 %v307_v14  ;;  %116 = vperm.xlu0 %276, %v104_v13  }
  0xd8   :  { %151 = vperm.xlu1 %278, %v268_v12  }
  0xdb   :  { %280 = vset.pattern.permute.xlu0 %v307_v14 }
  0xdc   :  { %279 = vset.pattern.permute.xlu1 %v305_v2  ;;  %147 = vperm.xlu0 %280, %v104_v13  }
  0xdd   :  { %131 = vperm.xlu1 %279, %v104_v13  }
  0xe0   :  { %282 = vset.pattern.permute.xlu0 %v308_v15 }
  0xe1   :  { %281 = vset.pattern.permute.xlu1 %v308_v15  ;;  %167 = vperm.xlu0 %282, %v268_v12  }
  0xe2   :  { %163 = vperm.xlu1 %281, %v104_v13  }
 0x14e   :  { %v136_v18 = vpop.permute.xlu1 %135  ;;  %v122_v19 = vpop.permute.xlu0 %121 }
 0x14f   :  { %v143_v30 = vmul.f32 %v141_v25, %v136_v18  ;;  %v129_v31 = vmul.f32 %v127_v26, %v122_v19 }
 0x151   :  { %v145_v39 = vadd.f32 %v143_v30, %v129_v31 }
 0x152   :  { %v117_v24 = vpop.permute.xlu0 %116 }
 0x153   :  { %v152_v27 = vpop.permute.xlu1 %151  ;;  %v128_v34 = vmul.f32 %v127_v26, %v117_v24 }
 0x154   :  { %v159_v35 = vmul.f32 %v157_v28, %v152_v27 }
 0x156   :  { %v161_v46 = vadd.f32 %v159_v35, %v145_v39 }
 0x157   :  { %v148_v32 = vpop.permute.xlu0 %147 }
 0x158   :  { %v132_v33 = vpop.permute.xlu1 %131  ;;  %v158_v40 = vmul.f32 %v157_v28, %v148_v32 }
 0x159   :  { %v142_v36 = vmul.f32 %v141_v25, %v132_v33 }
 0x15b   :  { %v144_v41 = vadd.f32 %v142_v36, %v128_v34 }
 0x15c   :  { %v168_v45 = vpop.permute.xlu0 %167 }
 0x15d   :  { %v175_v48 = vmul.f32 %v173_v37, %v168_v45  ;;  %v164_v49 = vpop.permute.xlu1 %163  ;;  %v160_v50 = vadd.f32 %v158_v40, %v144_v41 }
 0x15e   :  { %v174_v53 = vmul.f32 %v173_v37, %v164_v49 }
 0x15f   :  { %v177_v54 = vadd.f32 %v175_v48, %v161_v46 }
 0x160   :  { %v176_v56 = vadd.f32 %v174_v53, %v160_v50 }
 0x161   :  { %vm185_vm1 = vcmp.gt.f32.partialorder %v177_v54, %v183_v43  ;;  %vm197_vm2 = vcmp.gt.f32.partialorder %v177_v54, %v195_v44  ;;  %vm211_vm3 = vcmp.gt.f32.partialorder %v177_v54, %v209_v47 }
 0x162   :  { %v191_v57 = vsel %vm185_vm1, %v189_v51, 0.0  ;;  %v203_v58 = vsel %vm197_vm2, %v201_v52, 0.0  ;;  %vm184_vm4 = vcmp.gt.f32.partialorder %v176_v56, %v183_v43  ;;  %vm196_vm5 = vcmp.gt.f32.partialorder %v176_v56, %v195_v44 }
 0x163   :  { %v205_v59 = vadd.f32 %v203_v58, %v191_v57  ;;  %v190_v60 = vsel %vm184_vm4, %v189_v51, 0.0  ;;  %vm210_vm6 = vcmp.gt.f32.partialorder %v176_v56, %v209_v47  ;;  %v217_v61 = vsel %vm211_vm3, %v215_v55, 0.0 }
 0x164   :  { %v202_v62 = vsel %vm196_vm5, %v201_v52, 0.0  ;;  %v216_v1 = vsel %vm210_vm6, %v215_v55, 0.0 }
 0x165   :  { %v219_v63 = vadd.f32 %v217_v61, %v205_v59  ;;  %v204_v0 = vadd.f32 %v202_v62, %v190_v60 }
 0x167   :  { %221 = vst.msk [vmem:[#allocation2 + $0x8] sm:$0xff] %vm31_vm0, %v219_v63  ;;  %v218_v2 = vadd.f32 %v216_v1, %v204_v0 }
 0x169   :  { %220 = vst.msk [vmem:[#allocation2] sm:$0xff] %vm31_vm0, %v218_v2 }
 0x16a   :  { %294 = shalt.err (!%p291_p4)
}
 0x16b   :  { %s310_s17 = smov 128   ;;  %s311_s18 = smov 8  }
 0x16c   :  { %233 = dma.vmem_to_hbm [thread:$0]  %s228_s4, 256, %s393_s5, [#allocation3], %s310_s17, %s310_s17, %s311_s18  }
 0x16d   :  { %303 = dma.done.wait [#allocation3], 256  }
 0x16e   :  { %304 = vsyncadd [#allocation3], 4294967040 }
 0x16f   :  { %237 = vsyncpa [#allocation3], 1 }

</bundles_post_ra>
